<compile_context>
chip_gen: v7x
topology: tpu7x:2x2x1
jax: 0.10.0
libtpu: 0.0.40
codegen_flags: <defaults>
</compile_context>

<pallas_src>
import functools

import jax
import jax.numpy as jnp
from jax.experimental import pallas as pl
from jax.experimental.pallas import tpu as pltpu

LANE = 128
SUBLANE = 8
MIB = 1024 * 1024


def _round_up(x, m):
    return (x + m - 1) // m * m


def _pad2(a, rows, cols):
    return jnp.pad(a, ((0, rows - a.shape[0]), (0, cols - a.shape[1])))


# ---------------------------------------------------------------------------
# Kernel: K-tiled layer 1 with f32 accumulator, fused epilogue on last K step.
# ---------------------------------------------------------------------------
def _mlp_kernel(x_ref, w1_ref, b1_ref, w2_ref, b2_ref, w3_ref, b3_ref,
                o_ref, acc_ref):
    k = pl.program_id(1)

    @pl.when(k == 0)
    def _():
        acc_ref[...] = jnp.zeros_like(acc_ref)

    # Layer 1 partial product for this K slice (bf16 MXU, f32 accumulation).
    acc_ref[...] += jnp.dot(x_ref[...], w1_ref[...],
                            preferred_element_type=jnp.float32)

    @pl.when(k == pl.num_programs(1) - 1)
    def _():
        # Bias + ReLU (Dropout = identity in eval).  f32 VPU path.
        h = jnp.maximum(acc_ref[...] + b1_ref[...], 0.0)
        # Layer 2: Linear + ReLU (Dropout = identity in eval).
        h = jnp.dot(h.astype(jnp.bfloat16), w2_ref[...],
                    preferred_element_type=jnp.float32)
        h = jnp.maximum(h + b2_ref[...], 0.0)
        # Layer 3: output head.
        out = jnp.dot(h.astype(jnp.bfloat16), w3_ref[...],
                      preferred_element_type=jnp.float32)
        o_ref[...] = (out + b3_ref[...]).astype(o_ref.dtype)


# ---------------------------------------------------------------------------
# Tile-size heuristics.
# ---------------------------------------------------------------------------
def _choose_tile_b(batch):
    b8 = _round_up(max(batch, 1), SUBLANE)
    if b8 >= 512:
        return 256        # fills 256-wide MXU on v6e/v7x, >=2 tiles for megacore
    if b8 >= 128:
        return 128        # >=1-2 tiles; still a full MXU pass on v5e
    return b8             # small batch: weight-bandwidth-bound, keep it tight


def _choose_tk(in_dim, hid_pad, out_pad, *, max_tile_b=256,
               vmem_budget_bytes=40 * MIB, tk_cap=4096):
    """Pick the layer-1 K tile so the pipeline fits a conservative VMEM budget
    (safe for v7x's 64 MiB physical VMEM as well as v5e/v6e)."""
    in_pad_min = _round_up(in_dim, LANE)
    fixed = (hid_pad * hid_pad * 2            # w2 (bf16, single-buffered)
             + hid_pad * out_pad * 2          # w3 (bf16, single-buffered)
             + max_tile_b * hid_pad * 4       # f32 accumulator scratch
             + 2 * max_tile_b * out_pad * 4   # output block (f32, 2-buf)
             + (2 * hid_pad + out_pad) * 4)   # biases
    per_tk = 2 * (max_tile_b * 2) + 2 * (hid_pad * 2)   # x 2-buf + w1 2-buf
    tk = (vmem_budget_bytes - fixed) // per_tk
    tk = max(LANE, (tk // LANE) * LANE)
    return int(min(tk, tk_cap, in_pad_min))


def _estimate_vmem_bytes(tile_b, tk, hid_pad, out_pad):
    return (2 * tile_b * tk * 2          # x block, bf16, double-buffered
            + 2 * tk * hid_pad * 2       # w1 block, bf16, double-buffered
            + hid_pad * hid_pad * 2      # w2, single-buffered
            + hid_pad * out_pad * 2      # w3, single-buffered
            + (2 * hid_pad + out_pad) * 4
            + tile_b * hid_pad * 4       # accumulator scratch
            + 2 * tile_b * out_pad * 4)  # output block, f32, double-buffered


# ---------------------------------------------------------------------------
# One-time parameter preparation (hoisted out of the per-call forward).
# ---------------------------------------------------------------------------
def prepare_params(params):
    """Pad + cast weights once; returns everything the forward needs."""
    w1, b1, w2, b2, w3, b3 = params
    in_dim, hid = w1.shape
    out_dim = w3.shape[1]

    hid_pad = _round_up(hid, LANE)
    out_pad = _round_up(out_dim, LANE)
    tk = _choose_tk(in_dim, hid_pad, out_pad)
    in_pad = _round_up(in_dim, tk)       # every K block is full (zero-padded)

    prepared = {
        "w1": _pad2(w1, in_pad, hid_pad).astype(jnp.bfloat16),
        "w2": _pad2(w2, hid_pad, hid_pad).astype(jnp.bfloat16),
        "w3": _pad2(w3, hid_pad, out_pad).astype(jnp.bfloat16),
        "b1": _pad2(b1, 1, hid_pad),     # biases stay f32 (VPU path)
        "b2": _pad2(b2, 1, hid_pad),
        "b3": _pad2(b3, 1, out_pad),
        "in_dim": in_dim, "out_dim": out_dim,
        "in_pad": in_pad, "hid_pad": hid_pad, "out_pad": out_pad,
        "tk": tk,
    }
    return prepared


# ---------------------------------------------------------------------------
# Forward pass.
# ---------------------------------------------------------------------------
def vision_encoder_forward(x_nchw, prepared):
    """x_nchw: (B, C, H, W) float32.  Returns (B, output_dim) float32."""
    in_dim = prepared["in_dim"]
    out_dim = prepared["out_dim"]
    in_pad = prepared["in_pad"]
    hid_pad = prepared["hid_pad"]
    out_pad = prepared["out_pad"]
    tk = prepared["tk"]

    B = x_nchw.shape[0]
    # Flatten exactly like torch's x.view(B, -1) (row-major over C, H, W).
    x = x_nchw.reshape(B, -1)
    assert x.shape[1] == in_dim

    tile_b = _choose_tile_b(B)
    b_pad = _round_up(B, tile_b)
    grid_b = b_pad // tile_b
    grid_k = in_pad // tk

    # Skip the pad when already tile-aligned; only cast to bf16 for the MXU.
    # TODO(synk): with allow_input_fusion the f32->bf16 convert could fuse
    # into the pallas_call input instead of materializing x_p in HBM.
    if x.shape == (b_pad, in_pad):
        x_p = x.astype(jnp.bfloat16)
    else:
        x_p = _pad2(x, b_pad, in_pad).astype(jnp.bfloat16)

    resident = functools.partial(pl.BlockSpec, pipeline_mode=pl.Buffered(1))

    grid_spec = pltpu.PrefetchScalarGridSpec(
        num_scalar_prefetch=0,
        grid=(grid_b, grid_k),                # K last, reduction axis
        in_specs=[
            # x: streamed (tile_b, tk) blocks, default double-buffering.
            pl.BlockSpec((tile_b, tk), lambda i, k: (i, k)),
            # w1: streamed (tk, hid_pad) blocks along K.
            pl.BlockSpec((tk, hid_pad), lambda i, k: (k, 0)),
            # Constant-index operands: fetched once, single-buffered.
            resident((1, hid_pad), lambda i, k: (0, 0)),
            resident((hid_pad, hid_pad), lambda i, k: (0, 0)),
            resident((1, hid_pad), lambda i, k: (0, 0)),
            resident((hid_pad, out_pad), lambda i, k: (0, 0)),
            resident((1, out_pad), lambda i, k: (0, 0)),
        ],
        out_specs=pl.BlockSpec((tile_b, out_pad), lambda i, k: (i, 0)),
        scratch_shapes=[pltpu.VMEM((tile_b, hid_pad), jnp.float32)],
    )

    est = _estimate_vmem_bytes(tile_b, tk, hid_pad, out_pad)
    vmem_limit = int(max(32 * MIB, min(56 * MIB, est + 12 * MIB)))

    out_padded = pl.pallas_call(
        _mlp_kernel,
        out_shape=jax.ShapeDtypeStruct((b_pad, out_pad), jnp.float32),
        grid_spec=grid_spec,
        compiler_params=pltpu.CompilerParams(
            # Batch axis shards across TCs; K axis carries the f32 accumulator
            # so it MUST be "arbitrary" (and last).
            dimension_semantics=("parallel", "arbitrary"),
            vmem_limit_bytes=vmem_limit,
        ),
    )(x_p, prepared["w1"], prepared["b1"], prepared["w2"], prepared["b2"],
      prepared["w3"], prepared["b3"])

    # Slice back to the logical (B, output_dim) result.
    return out_padded[:B, :out_dim]


# ---------------------------------------------------------------------------
# Params / reference.
# ---------------------------------------------------------------------------
def init_params(key, input_dim, hidden_dim, output_dim):
    """Deterministic init; weights stored as (in, out) = PyTorch weight.T."""
    k1, k2, k3, k4, k5, k6 = jax.random.split(key, 6)

    def uniform(k, shape, fan_in):
        bound = 1.0 / jnp.sqrt(fan_in)
        return jax.random.uniform(k, shape, jnp.float32, -bound, bound)

    w1 = uniform(k1, (input_dim, hidden_dim), input_dim)
    b1 = uniform(k2, (1, hidden_dim), input_dim)
    w2 = uniform(k3, (hidden_dim, hidden_dim), hidden_dim)
    b2 = uniform(k4, (1, hidden_dim), hidden_dim)
    w3 = uniform(k5, (hidden_dim, output_dim), hidden_dim)
    b3 = uniform(k6, (1, output_dim), hidden_dim)
    return (w1, b1, w2, b2, w3, b3)


def reference_forward(x_nchw, params):
    """Pure f32 reference matching the PyTorch module in eval mode."""
    w1, b1, w2, b2, w3, b3 = params
    x = x_nchw.reshape(x_nchw.shape[0], -1)
    h = jnp.maximum(x @ w1 + b1, 0.0)
    h = jnp.maximum(h @ w2 + b2, 0.0)
    return h @ w3 + b3


if __name__ == "__main__":
    # Small shapes consistent with the module: (B, 3, H, W) image input,
    # flattened dim = 3*16*16 = 768, hidden = 32, output = 16.
    B, C, H, W = 2, 3, 16, 16
    INPUT_DIM = C * H * W
    HIDDEN_DIM = 32
    OUTPUT_DIM = 16

    key = jax.random.PRNGKey(0)
    kx, kp = jax.random.split(key)
    x = jax.random.normal(kx, (B, C, H, W), dtype=jnp.float32)
    params = init_params(kp, INPUT_DIM, HIDDEN_DIM, OUTPUT_DIM)

    # Weight prep happens ONCE here, not inside the per-call forward.
    prepared = prepare_params(params)

    out = vision_encoder_forward(x, prepared)
    out = jax.block_until_ready(out)

    ref = jax.block_until_ready(reference_forward(x, params))
    assert out.shape == (B, OUTPUT_DIM)
    # Tolerance loosened vs the f32 reference because MXU operands are bf16
    # (f32 accumulation); errors at these magnitudes are ~1e-3.
    assert jnp.allclose(out, ref, atol=2e-2, rtol=2e-2), (
        float(jnp.max(jnp.abs(out - ref))))

    print("KERNEL_OK")
</pallas_src>

<mosaic_0001>
module attributes {stable_mosaic.version = 11 : i64} {
  func.func @_mlp_kernel(%arg0: i32, %arg1: i32, %arg2: memref<8x768xbf16, #tpu.memory_space<vmem>>, %arg3: memref<768x128xbf16, #tpu.memory_space<vmem>>, %arg4: memref<1x128xf32, #tpu.memory_space<vmem>>, %arg5: memref<128x128xbf16, #tpu.memory_space<vmem>>, %arg6: memref<1x128xf32, #tpu.memory_space<vmem>>, %arg7: memref<128x128xbf16, #tpu.memory_space<vmem>>, %arg8: memref<1x128xf32, #tpu.memory_space<vmem>>, %arg9: memref<8x128xf32, #tpu.memory_space<vmem>>, %arg10: memref<8x128xf32, #tpu.memory_space<vmem>>) attributes {dimension_semantics = [#tpu.dimension_semantics<parallel>, #tpu.dimension_semantics<arbitrary>], iteration_bounds = array<i64: 1, 1>, scalar_prefetch = 0 : i64, scratch_operands = 1 : i64, tpu.core_type = #tpu.core_type<tc>, window_params = [{transform_indices = @transform_0, window_bounds = array<i64: 8, 768>}, {transform_indices = @transform_1, window_bounds = array<i64: 768, 128>}, {pipeline_mode = #tpu.pipeline_mode<synchronous>, transform_indices = @transform_2, window_bounds = array<i64: 1, 128>}, {pipeline_mode = #tpu.pipeline_mode<synchronous>, transform_indices = @transform_3, window_bounds = array<i64: 128, 128>}, {pipeline_mode = #tpu.pipeline_mode<synchronous>, transform_indices = @transform_4, window_bounds = array<i64: 1, 128>}, {pipeline_mode = #tpu.pipeline_mode<synchronous>, transform_indices = @transform_5, window_bounds = array<i64: 128, 128>}, {pipeline_mode = #tpu.pipeline_mode<synchronous>, transform_indices = @transform_6, window_bounds = array<i64: 1, 128>}, {transform_indices = @transform_7, window_bounds = array<i64: 8, 128>}]} {
    %c0_i32 = arith.constant 0 : i32
    %0 = arith.cmpi eq, %arg1, %c0_i32 : i32
    %1 = arith.extui %0 : i1 to i32
    %c0_i32_0 = arith.constant 0 : i32
    %2 = arith.cmpi ne, %1, %c0_i32_0 : i32
    scf.if %2 {
      %cst_10 = arith.constant 0.000000e+00 : f32
      %12 = vector.broadcast %cst_10 : f32 to vector<8x128xf32>
      %c0_11 = arith.constant 0 : index
      %c0_12 = arith.constant 0 : index
      %13 = vector.load %arg10[%c0_11, %c0_12] : memref<8x128xf32, #tpu.memory_space<vmem>>, vector<8x128xf32>
      tpu.vector_store %arg10[%c0_11, %c0_12], %12 {strides = array<i32>} : memref<8x128xf32, #tpu.memory_space<vmem>>, vector<8x128xf32>,
    } else {
    }
    %c0 = arith.constant 0 : index
    %c0_1 = arith.constant 0 : index
    %3 = vector.load %arg10[%c0, %c0_1] : memref<8x128xf32, #tpu.memory_space<vmem>>, vector<8x128xf32>
    %c0_2 = arith.constant 0 : index
    %c0_3 = arith.constant 0 : index
    %4 = vector.load %arg2[%c0_2, %c0_3] : memref<8x768xbf16, #tpu.memory_space<vmem>>, vector<8x768xbf16>
    %c0_4 = arith.constant 0 : index
    %c0_5 = arith.constant 0 : index
    %5 = vector.load %arg3[%c0_4, %c0_5] : memref<768x128xbf16, #tpu.memory_space<vmem>>, vector<768x128xbf16>
    %cst = arith.constant dense<0.000000e+00> : vector<8x128xf32>
    %6 = tpu.matmul %4, %5, %cst {dimension_numbers = #tpu.dot_dimension_numbers<[1], [0], [0], [1], [0, 0, 1, 1], [], []>} : vector<8x768xbf16>, vector<768x128xbf16>, vector<8x128xf32> -> vector<8x128xf32>
    %7 = arith.addf %3, %6 : vector<8x128xf32>
    %c0_6 = arith.constant 0 : index
    %c0_7 = arith.constant 0 : index
    %8 = vector.load %arg10[%c0_6, %c0_7] : memref<8x128xf32, #tpu.memory_space<vmem>>, vector<8x128xf32>
    tpu.vector_store %arg10[%c0_6, %c0_7], %7 {strides = array<i32>} : memref<8x128xf32, #tpu.memory_space<vmem>>, vector<8x128xf32>,
    %c0_i32_8 = arith.constant 0 : i32
    %9 = arith.cmpi eq, %arg1, %c0_i32_8 : i32
    %10 = arith.extui %9 : i1 to i32
    %c0_i32_9 = arith.constant 0 : i32
    %11 = arith.cmpi ne, %10, %c0_i32_9 : i32
    scf.if %11 {
      %c0_10 = arith.constant 0 : index
      %c0_11 = arith.constant 0 : index
      %12 = vector.load %arg10[%c0_10, %c0_11] : memref<8x128xf32, #tpu.memory_space<vmem>>, vector<8x128xf32>
      %c0_12 = arith.constant 0 : index
      %c0_13 = arith.constant 0 : index
      %13 = vector.load %arg4[%c0_12, %c0_13] : memref<1x128xf32, #tpu.memory_space<vmem>>, vector<1x128xf32>
      %14 = vector.broadcast %13 : vector<1x128xf32> to vector<8x128xf32>
      %15 = arith.addf %12, %14 : vector<8x128xf32>
      %cst_14 = arith.constant 0.000000e+00 : f32
      %16 = vector.broadcast %cst_14 : f32 to vector<8x128xf32>
      %17 = arith.maximumf %15, %16 : vector<8x128xf32>
      %18 = arith.truncf %17 : vector<8x128xf32> to vector<8x128xbf16>
      %c0_15 = arith.constant 0 : index
      %c0_16 = arith.constant 0 : index
      %19 = vector.load %arg5[%c0_15, %c0_16] : memref<128x128xbf16, #tpu.memory_space<vmem>>, vector<128x128xbf16>
      %cst_17 = arith.constant dense<0.000000e+00> : vector<8x128xf32>
      %20 = tpu.matmul %18, %19, %cst_17 {dimension_numbers = #tpu.dot_dimension_numbers<[1], [0], [0], [1], [0, 0, 1, 1], [], []>} : vector<8x128xbf16>, vector<128x128xbf16>, vector<8x128xf32> -> vector<8x128xf32>
      %c0_18 = arith.constant 0 : index
      %c0_19 = arith.constant 0 : index
      %21 = vector.load %arg6[%c0_18, %c0_19] : memref<1x128xf32, #tpu.memory_space<vmem>>, vector<1x128xf32>
      %22 = vector.broadcast %21 : vector<1x128xf32> to vector<8x128xf32>
      %23 = arith.addf %20, %22 : vector<8x128xf32>
      %cst_20 = arith.constant 0.000000e+00 : f32
      %24 = vector.broadcast %cst_20 : f32 to vector<8x128xf32>
      %25 = arith.maximumf %23, %24 : vector<8x128xf32>
      %26 = arith.truncf %25 : vector<8x128xf32> to vector<8x128xbf16>
      %c0_21 = arith.constant 0 : index
      %c0_22 = arith.constant 0 : index
      %27 = vector.load %arg7[%c0_21, %c0_22] : memref<128x128xbf16, #tpu.memory_space<vmem>>, vector<128x128xbf16>
      %cst_23 = arith.constant dense<0.000000e+00> : vector<8x128xf32>
      %28 = tpu.matmul %26, %27, %cst_23 {dimension_numbers = #tpu.dot_dimension_numbers<[1], [0], [0], [1], [0, 0, 1, 1], [], []>} : vector<8x128xbf16>, vector<128x128xbf16>, vector<8x128xf32> -> vector<8x128xf32>
      %c0_24 = arith.constant 0 : index
      %c0_25 = arith.constant 0 : index
      %29 = vector.load %arg8[%c0_24, %c0_25] : memref<1x128xf32, #tpu.memory_space<vmem>>, vector<1x128xf32>
      %30 = vector.broadcast %29 : vector<1x128xf32> to vector<8x128xf32>
      %31 = arith.addf %28, %30 : vector<8x128xf32>
      %c0_26 = arith.constant 0 : index
      %c0_27 = arith.constant 0 : index
      %32 = vector.load %arg9[%c0_26, %c0_27] : memref<8x128xf32, #tpu.memory_space<vmem>>, vector<8x128xf32>
      tpu.vector_store %arg9[%c0_26, %c0_27], %31 {strides = array<i32>} : memref<8x128xf32, #tpu.memory_space<vmem>>, vector<8x128xf32>,
    } else {
    }
    return
  }
  func.func @transform_0(%arg0: i32, %arg1: i32) -> (i32, i32) {
    %c0_i32 = arith.constant 0 : i32
    return %arg0, %arg1 : i32, i32
  }
  func.func @transform_1(%arg0: i32, %arg1: i32) -> (i32, i32) {
    %c0_i32 = arith.constant 0 : i32
    %c0_i32_0 = arith.constant 0 : i32
    return %arg1, %c0_i32 : i32, i32
  }
  func.func @transform_2(%arg0: i32, %arg1: i32) -> (i32, i32) {
    %c0_i32 = arith.constant 0 : i32
    %c0_i32_0 = arith.constant 0 : i32
    %c0_i32_1 = arith.constant 0 : i32
    return %c0_i32, %c0_i32_0 : i32, i32
  }
  func.func @transform_3(%arg0: i32, %arg1: i32) -> (i32, i32) {
    %c0_i32 = arith.constant 0 : i32
    %c0_i32_0 = arith.constant 0 : i32
    %c0_i32_1 = arith.constant 0 : i32
    return %c0_i32, %c0_i32_0 : i32, i32
  }
  func.func @transform_4(%arg0: i32, %arg1: i32) -> (i32, i32) {
    %c0_i32 = arith.constant 0 : i32
    %c0_i32_0 = arith.constant 0 : i32
    %c0_i32_1 = arith.constant 0 : i32
    return %c0_i32, %c0_i32_0 : i32, i32
  }
  func.func @transform_5(%arg0: i32, %arg1: i32) -> (i32, i32) {
    %c0_i32 = arith.constant 0 : i32
    %c0_i32_0 = arith.constant 0 : i32
    %c0_i32_1 = arith.constant 0 : i32
    return %c0_i32, %c0_i32_0 : i32, i32
  }
  func.func @transform_6(%arg0: i32, %arg1: i32) -> (i32, i32) {
    %c0_i32 = arith.constant 0 : i32
    %c0_i32_0 = arith.constant 0 : i32
    %c0_i32_1 = arith.constant 0 : i32
    return %c0_i32, %c0_i32_0 : i32, i32
  }
  func.func @transform_7(%arg0: i32, %arg1: i32) -> (i32, i32) {
    %c0_i32 = arith.constant 0 : i32
    %c0_i32_0 = arith.constant 0 : i32
    return %arg0, %c0_i32 : i32, i32
  }
}

</mosaic_0001>

<bundles_post_ra>
// kernel: tpu_custom_call.1
= control target key start
LH: loop header
LB: loop body
LE: loop exit
PB: predicated region body
PF: predicated region fallthrough
CT: control target
= control target key end

     0   :  { %12 = vsyncpa [#allocation4], 0  ;;  %s1412_s0 = inlined_call_operand.hbm [shape: bf16[8,768], index: 0, kind: input, shape index: {}]   ;;  %s1413_s1 = inlined_call_operand.hbm [shape: bf16[768,128], index: 1, kind: input, shape index: {}]   ;;  %s1414_s2 = inlined_call_operand.vmem [shape: f32[1,128], index: 2, kind: input, shape index: {}]   ;;  %s1415_s3 = inlined_call_operand.hbm [shape: bf16[128,128], index: 3, kind: input, shape index: {}]   ;;  %s1416_s4 = inlined_call_operand.vmem [shape: f32[1,128], index: 4, kind: input, shape index: {}]   ;;  %s1417_s5 = inlined_call_operand.hbm [shape: bf16[128,128], index: 5, kind: input, shape index: {}]   ;;  %s1418_s6 = inlined_call_operand.vmem [shape: f32[1,128], index: 6, kind: input, shape index: {}]   ;;  %s1419_s7 = inlined_call_operand.hbm [shape: f32[8,128], index: 7, kind: output, shape index: {}]  }
   0x1   :  { %13 = vsyncpa [#allocation7], 0 }
   0x2   :  { %14 = vsyncpa [#allocation10], 0 }
   0x3   :  { %15 = vsyncpa [#allocation5], 0  ;;  %s1267_s24 = smov [#allocation6]   ;;  %s1149_s28 = scalar_lea.hbm %s1413_s1, 6144 }
   0x4   :  { %s31_s25 = sshll.u32 %s1267_s24, 4  ;;  %p1150_p0 = scmp.ne.s32.totalorder %s1413_s1, %s1149_s28  ;;  %s32_s25 = int_to_ptr.vmem [resolvable:$true] %s31_s25 }
   0x5   :  { %p1153_p1 = scmp.lt.u32.totalorder %s1149_s28, %s1413_s1 }
   0x7   :  { %p1155_p2 = pnand %p1153_p1, %p1150_p0 }
   0x9   :  { %1158 = shalt.err (!%p1155_p2)
}
   0xa   :  { %s1159_s10 = scalar_lea.vmem %s32_s25, 6144  ;;  %p1164_p4 = scmp.lt.s32.totalorder %s32_s25, %s32_s25 }
   0xb   :  { %p1160_p3 = scmp.ne.s32.totalorder %s32_s25, %s1159_s10  ;;  %p1165_p5 = scmp.lt.s32.totalorder %s1159_s10, %s1159_s10 }
   0xd   :  { %p1166_p6 = por %p1165_p5, %p1164_p4 }
   0xf   :  { %p1167_p7 = pnand %p1166_p6, %p1160_p3 }
  0x11   :  { %1170 = shalt.err (!%p1167_p7)
}
  0x12   :  { %s1268_s11 = smov 64   ;;  %s1269_s12 = smov 4  }
  0x13   :  { %37 = dma.hbm_to_vmem [thread:$0]  %s1413_s1, 6144, %s32_s25, [#allocation7], %s1268_s11, %s1268_s11, %s1269_s12  }
  0x14   :  { %s1270_s15 = smov [#allocation3]   ;;  %s1271_s17 = smov [#allocation8]  }
  0x15   :  { %s22_s16 = sshll.u32 %s1270_s15, 4  ;;  %s45_s18 = sshll.u32 %s1271_s17, 4  ;;  %s23_s16 = int_to_ptr.vmem [resolvable:$true] %s22_s16  ;;  %s46_s18 = int_to_ptr.vmem [resolvable:$true] %s45_s18 }
  0x16   :  { %s1171_s21 = scalar_lea.hbm %s1412_s0, 384 }
  0x17   :  { %p1172_p8 = scmp.ne.s32.totalorder %s1412_s0, %s1171_s21  ;;  %p1175_p9 = scmp.lt.u32.totalorder %s1171_s21, %s1412_s0 }
  0x19   :  { %p1177_p10 = pnand %p1175_p9, %p1172_p8 }
  0x1b   :  { %1180 = shalt.err (!%p1177_p10)
}
  0x1c   :  { %s1181_s1 = scalar_lea.vmem %s23_s16, 384  ;;  %p1186_p12 = scmp.lt.s32.totalorder %s23_s16, %s23_s16 }
  0x1d   :  { %p1182_p11 = scmp.ne.s32.totalorder %s23_s16, %s1181_s1  ;;  %p1187_p13 = scmp.lt.s32.totalorder %s1181_s1, %s1181_s1 }
  0x1f   :  { %p1188_p0 = por %p1187_p13, %p1186_p12 }
  0x21   :  { %p1189_p1 = pnand %p1188_p0, %p1182_p11 }
  0x23   :  { %1192 = shalt.err (!%p1189_p1)
}
  0x24   :  { %25 = dma.hbm_to_vmem [thread:$0]  %s1412_s0, 384, %s23_s16, [#allocation4]  }
  0x25   :  { %s1193_s30 = scalar_lea.hbm %s1415_s3, 1024 }
  0x26   :  { %p1194_p2 = scmp.ne.s32.totalorder %s1415_s3, %s1193_s30  ;;  %p1197_p3 = scmp.lt.u32.totalorder %s1193_s30, %s1415_s3 }
  0x28   :  { %p1199_p4 = pnand %p1197_p3, %p1194_p2 }
  0x2a   :  { %1202 = shalt.err (!%p1199_p4)
}
  0x2b   :  { %s1203_s14 = scalar_lea.vmem %s46_s18, 1024  ;;  %p1208_p6 = scmp.lt.s32.totalorder %s46_s18, %s46_s18 }
  0x2c   :  { %p1204_p5 = scmp.ne.s32.totalorder %s46_s18, %s1203_s14  ;;  %p1209_p7 = scmp.lt.s32.totalorder %s1203_s14, %s1203_s14 }
  0x2e   :  { %p1210_p8 = por %p1209_p7, %p1208_p6 }
  0x30   :  { %p1211_p9 = pnand %p1210_p8, %p1204_p5 }
  0x32   :  { %1214 = shalt.err (!%p1211_p9)
}
  0x33   :  { %51 = dma.hbm_to_vmem [thread:$0]  %s1415_s3, 1024, %s46_s18, [#allocation7], %s1268_s11, %s1268_s11, %s1269_s12  }
  0x34   :  { %s1272_s16 = smov [#allocation9]   ;;  %s1215_s21 = scalar_lea.hbm %s1417_s5, 1024 }
  0x35   :  { %s59_s17 = sshll.u32 %s1272_s16, 4  ;;  %p1216_p10 = scmp.ne.s32.totalorder %s1417_s5, %s1215_s21  ;;  %s60_s17 = int_to_ptr.vmem [resolvable:$true] %s59_s17 }
  0x36   :  { %p1219_p11 = scmp.lt.u32.totalorder %s1215_s21, %s1417_s5 }
  0x38   :  { %p1221_p12 = pnand %p1219_p11, %p1216_p10 }
  0x3a   :  { %1224 = shalt.err (!%p1221_p12)
}
  0x3b   :  { %s1225_s1 = scalar_lea.vmem %s60_s17, 1024  ;;  %p1230_p0 = scmp.lt.s32.totalorder %s60_s17, %s60_s17 }
  0x3c   :  { %p1226_p13 = scmp.ne.s32.totalorder %s60_s17, %s1225_s1  ;;  %p1231_p1 = scmp.lt.s32.totalorder %s1225_s1, %s1225_s1 }
  0x3e   :  { %p1232_p2 = por %p1231_p1, %p1230_p0 }
  0x40   :  { %p1233_p3 = pnand %p1232_p2, %p1226_p13 }
  0x42   :  { %1236 = shalt.err (!%p1233_p3)
}
  0x43   :  { %65 = dma.hbm_to_vmem [thread:$0]  %s1417_s5, 1024, %s60_s17, [#allocation10], %s1268_s11, %s1268_s11, %s1269_s12  }
  0x44   :  { %1259 = dma.done.wait [#allocation4], 384  }
  0x45   :  { %1260 = vsyncadd [#allocation4], 4294966912 }
  0x46   :  { %1261 = dma.done.wait [#allocation7], 7168  }
  0x47   :  { %1262 = vsyncadd [#allocation7], 4294960128 }
  0x48   :  { %1263 = dma.done.wait [#allocation10], 1024  }
  0x49   :  { %1264 = vsyncadd [#allocation10], 4294966272  ;;  %v1079_v0 = vld [vmem:[#allocation6 + $0x40] sm:$0xff]   ;;  %v1083_v4 = vld [vmem:[#allocation6 + $0x48] sm:$0xff]   ;;  %v1273_v58 = vmov 0.0   ;;  %vm1274_vm0 = vmmov 0  }
  0x4a   :  { %v1080_v1 = vld [vmem:[#allocation6 + $0xc0] sm:$0xff]   ;;  %946 = vmatprep.subr.bf16.mxu0 %v1079_v0  ;;  %v1084_v5 = vld [vmem:[#allocation6 + $0xc8] sm:$0xff]   ;;  %v1087_v8 = vld [vmem:[#allocation6 + $0x50] sm:$0xff]   ;;  %s1275_s28 = smov [#allocation11]  }
  0x4b   :  { %v1081_v2 = vld [vmem:[#allocation6] sm:$0xff]   ;;  %968 = vmatprep.subr.bf16.mxu1 %v1080_v1  ;;  %v1085_v6 = vld [vmem:[#allocation6 + $0x8] sm:$0xff]   ;;  %v1088_v9 = vld [vmem:[#allocation6 + $0xd0] sm:$0xff]   ;;  %s862_s29 = sshll.u32 %s1275_s28, 4  ;;  %s863_s29 = int_to_ptr.vmem [resolvable:$true] %s862_s29 }
  0x4c   :  { %v1082_v3 = vld [vmem:[#allocation6 + $0x80] sm:$0xff]   ;;  %947 = vmatpush3.bf16.msra.mxu0 %v1081_v2  ;;  %v1086_v7 = vld [vmem:[#allocation6 + $0x88] sm:$0xff]   ;;  %v1089_v10 = vld [vmem:[#allocation6 + $0x10] sm:$0xff]   ;;  %p1242_p5 = scmp.lt.s32.totalorder %s863_s29, %s863_s29 }
  0x4d   :  { %969 = vmatpush3.bf16.msra.mxu1 %v1082_v3  ;;  %948 = vmatprep.subr.bf16.mxu0 %v1083_v4  ;;  %v1090_v11 = vld [vmem:[#allocation6 + $0x90] sm:$0xff]   ;;  %v1091_v12 = vld [vmem:[#allocation6 + $0x58] sm:$0xff]   ;;  %v1095_v16 = vld [vmem:[#allocation6 + $0x60] sm:$0xff]  }
  0x4e   :  { %970 = vmatprep.subr.bf16.mxu1 %v1084_v5  ;;  %v1092_v13 = vld [vmem:[#allocation6 + $0xd8] sm:$0xff]   ;;  %v1096_v17 = vld [vmem:[#allocation6 + $0xe0] sm:$0xff]   ;;  %v1099_v20 = vld [vmem:[#allocation6 + $0x68] sm:$0xff]  }
  0x4f   :  { %v1093_v14 = vld [vmem:[#allocation6 + $0x18] sm:$0xff]   ;;  %v1097_v18 = vld [vmem:[#allocation6 + $0x20] sm:$0xff]   ;;  %v1100_v21 = vld [vmem:[#allocation6 + $0xe8] sm:$0xff]  }
  0x50   :  { %949 = vmatpush3.bf16.msra.mxu0 %v1085_v6  ;;  %v1094_v15 = vld [vmem:[#allocation6 + $0x98] sm:$0xff]   ;;  %v1098_v19 = vld [vmem:[#allocation6 + $0xa0] sm:$0xff]   ;;  %v1101_v22 = vld [vmem:[#allocation6 + $0x28] sm:$0xff]  }
  0x51   :  { %971 = vmatpush3.bf16.msra.mxu1 %v1086_v7  ;;  %950 = vmatprep.subr.bf16.mxu0 %v1087_v8  ;;  %v1102_v23 = vld [vmem:[#allocation6 + $0xa8] sm:$0xff]   ;;  %v1103_v24 = vld [vmem:[#allocation6 + $0x70] sm:$0xff]   ;;  %v1107_v28 = vld [vmem:[#allocation6 + $0x78] sm:$0xff]  }
  0x52   :  { %972 = vmatprep.subr.bf16.mxu1 %v1088_v9  ;;  %v1104_v25 = vld [vmem:[#allocation6 + $0xf0] sm:$0xff]   ;;  %v1108_v29 = vld [vmem:[#allocation6 + $0xf8] sm:$0xff]   ;;  %v87_v32 = vld [vmem:[#allocation3] sm:$0xff] }
  0x53   :  { %v1105_v26 = vld [vmem:[#allocation6 + $0x30] sm:$0xff]   ;;  %v1109_v30 = vld [vmem:[#allocation6 + $0x38] sm:$0xff]   ;;  %v873_v34 = vcombine.low %v87_v32, %v87_v32  ;;  %v874_v35 = vcombine.high %v87_v32, %v87_v32  ;;  %v1115_v38 = vld [vmem:[#allocation6 + $0x140] sm:$0xff]  }
  0x54   :  { %951 = vmatpush3.bf16.msra.mxu0 %v1089_v10  ;;  %v1106_v27 = vld [vmem:[#allocation6 + $0xb0] sm:$0xff]   ;;  %v1110_v31 = vld [vmem:[#allocation6 + $0xb8] sm:$0xff]   ;;  %v1116_v39 = vld [vmem:[#allocation6 + $0x100] sm:$0xff]  }
  0x55   :  { %973 = vmatpush3.bf16.msra.mxu1 %v1090_v11  ;;  %952 = vmatprep.subr.bf16.mxu0 %v1091_v12  ;;  %v88_v33 = vld [vmem:[#allocation3 + $0x8] sm:$0xff]  ;;  %v1117_v40 = vld [vmem:[#allocation6 + $0x148] sm:$0xff]   ;;  %v1121_v44 = vld [vmem:[#allocation6 + $0x158] sm:$0xff]  }
  0x56   :  { %974 = vmatprep.subr.bf16.mxu1 %v1092_v13  ;;  %v875_v36 = vcombine.low %v88_v33, %v88_v33  ;;  %v876_v37 = vcombine.high %v88_v33, %v88_v33  ;;  %527 = vmatprep.mubr.bf16.mxu0 %v874_v35  ;;  %v1118_v41 = vld [vmem:[#allocation6 + $0x108] sm:$0xff]   ;;  %v1119_v42 = vld [vmem:[#allocation6 + $0x150] sm:$0xff]   ;;  %v1122_v45 = vld [vmem:[#allocation6 + $0x118] sm:$0xff]  }
  0x57   :  { %v1120_v43 = vld [vmem:[#allocation6 + $0x110] sm:$0xff]   ;;  %v1123_v46 = vld [vmem:[#allocation6 + $0x160] sm:$0xff]   ;;  %v89_v48 = vld [vmem:[#allocation3 + $0x10] sm:$0xff] }
  0x58   :  { %953 = vmatpush3.bf16.msra.mxu0 %v1093_v14  ;;  %567 = vmatprep.mubr.bf16.mxu1 %v876_v37  ;;  %v1124_v47 = vld [vmem:[#allocation6 + $0x120] sm:$0xff]   ;;  %v1125_v49 = vld [vmem:[#allocation6 + $0x168] sm:$0xff]   ;;  %v878_v50 = vcombine.high %v89_v48, %v89_v48  ;;  %v1127_v52 = vld [vmem:[#allocation6 + $0x170] sm:$0xff]   ;;  %v877_v56 = vcombine.low %v89_v48, %v89_v48 }
  0x59   :  { %975 = vmatpush3.bf16.msra.mxu1 %v1094_v15  ;;  %954 = vmatprep.subr.bf16.mxu0 %v1095_v16  ;;  %v1126_v51 = vld [vmem:[#allocation6 + $0x128] sm:$0xff]   ;;  %v1128_v53 = vld [vmem:[#allocation6 + $0x130] sm:$0xff]   ;;  %v1129_v54 = vld [vmem:[#allocation6 + $0x178] sm:$0xff]  }
  0x5a   :  { %976 = vmatprep.subr.bf16.mxu1 %v1096_v17  ;;  %v1130_v55 = vld [vmem:[#allocation6 + $0x138] sm:$0xff]   ;;  %v1133_v57 = vld [vmem:[#allocation8] sm:$0xff]   ;;  %v1134_v59 = vld [vmem:[#allocation8 + $0x8] sm:$0xff]  }
  0x5b   :  { %v1135_v60 = vld [vmem:[#allocation8 + $0x10] sm:$0xff]   ;;  %v1136_v61 = vld [vmem:[#allocation8 + $0x18] sm:$0xff]   ;;  %v1137_v62 = vld [vmem:[#allocation8 + $0x20] sm:$0xff]  }
  0x5c   :  { %955 = vmatpush3.bf16.msra.mxu0 %v1097_v18  ;;  %v1138_v63 = vld [vmem:[#allocation8 + $0x28] sm:$0xff]   ;;  %v1139_v0 = vld [vmem:[#allocation8 + $0x30] sm:$0xff]   ;;  %v1140_v1 = vld [vmem:[#allocation8 + $0x38] sm:$0xff]  }
  0x5d   :  { %977 = vmatpush3.bf16.msra.mxu1 %v1098_v19  ;;  %956 = vmatprep.subr.bf16.mxu0 %v1099_v20  ;;  %v1141_v2 = vld [vmem:[#allocation9] sm:$0xff]   ;;  %v1142_v3 = vld [vmem:[#allocation9 + $0x8] sm:$0xff]   ;;  %v1143_v4 = vld [vmem:[#allocation9 + $0x10] sm:$0xff]  }
  0x5e   :  { %978 = vmatprep.subr.bf16.mxu1 %v1100_v21  ;;  %v1144_v5 = vld [vmem:[#allocation9 + $0x18] sm:$0xff]   ;;  %v1145_v6 = vld [vmem:[#allocation9 + $0x20] sm:$0xff]   ;;  %v1146_v7 = vld [vmem:[#allocation9 + $0x28] sm:$0xff]  }
  0x60   :  { %957 = vmatpush3.bf16.msra.mxu0 %v1101_v22 }
  0x61   :  { %979 = vmatpush3.bf16.msra.mxu1 %v1102_v23  ;;  %958 = vmatprep.subr.bf16.mxu0 %v1103_v24  ;;  %v927_v23 = vld [vmem:[%s1414_s2] ss:$0 sm:$0xff] }
  0x62   :  { %980 = vmatprep.subr.bf16.mxu1 %v1104_v25 }
  0x64   :  { %959 = vmatpush3.bf16.msra.mxu0 %v1105_v26 }
  0x65   :  { %981 = vmatpush3.bf16.msra.mxu1 %v1106_v27  ;;  %960 = vmatprep.subr.bf16.mxu0 %v1107_v28 }
  0x66   :  { %982 = vmatprep.subr.bf16.mxu1 %v1108_v29  ;;  %v1147_v29 = vld [vmem:[#allocation9 + $0x30] sm:$0xff]  }
  0x68   :  { %961 = vmatpush3.bf16.msra.mxu0 %v1109_v30  ;;  %v1148_v30 = vld [vmem:[#allocation9 + $0x38] sm:$0xff]  }
  0x69   :  { %983 = vmatpush3.bf16.msra.mxu1 %v1110_v31  ;;  %990 = vmatprep.subr.bf16.mxu0 %v1115_v38  ;;  %v928_v31 = vld [vmem:[%s1416_s4] ss:$0 sm:$0xff]  ;;  %s1237_s4 = scalar_lea.vmem %s863_s29, 128 }
  0x6a   :  { %1030 = vmatprep.subr.bf16.mxu1 %v1273_v58  ;;  %p1238_p4 = scmp.ne.s32.totalorder %s863_s29, %s1237_s4  ;;  %p1243_p6 = scmp.lt.s32.totalorder %s1237_s4, %s1237_s4 }
  0x6b   :  { %528 = vmatmul.mubr.bf16.vlgmr.msra.gmra.mrb[0].mxu0 %v873_v34 }
  0x6c   :  { %568 = vmatmul.mubr.bf16.vlgmr.msra.gmra.mrb[0].mxu1 %v875_v36  ;;  %991 = vmatpush3.bf16.msra.mxu0 %v1116_v39  ;;  %v937_v39 = vld [vmem:[%s1418_s6] ss:$0 sm:$0xff]  ;;  %p1244_p7 = por %p1243_p6, %p1242_p5 }
  0x6d   :  { %992 = vmatprep.subr.bf16.mxu0 %v1117_v40  ;;  %607 = vmatprep.mubr.bf16.mxu0 %v878_v50 }
  0x6e   :  { %1031 = vmatpush3.bf16.msra.mxu1 %v1133_v57  ;;  %1046 = vmatprep.mubr.msk.bf16.mxu1 %vm1274_vm0, %v1273_v58  ;;  %p1245_p8 = pnand %p1244_p7, %p1238_p4 }
  0x6f   :  { %1032 = vmatprep.subr.bf16.mxu1 %v1273_v58 }
  0x70   :  { %993 = vmatpush3.bf16.msra.mxu0 %v1118_v41 }
  0x71   :  { %994 = vmatprep.subr.bf16.mxu0 %v1119_v42 }
  0x72   :  { %1033 = vmatpush3.bf16.msra.mxu1 %v1134_v59 }
  0x73   :  { %1034 = vmatprep.subr.bf16.mxu1 %v1273_v58 }
  0x74   :  { %995 = vmatpush3.bf16.msra.mxu0 %v1120_v43 }
  0x75   :  { %996 = vmatprep.subr.bf16.mxu0 %v1121_v44 }
  0x76   :  { %1035 = vmatpush3.bf16.msra.mxu1 %v1135_v60 }
  0x77   :  { %1036 = vmatprep.subr.bf16.mxu1 %v1273_v58 }
  0x78   :  { %997 = vmatpush3.bf16.msra.mxu0 %v1122_v45 }
  0x79   :  { %998 = vmatprep.subr.bf16.mxu0 %v1123_v46 }
  0x7a   :  { %1037 = vmatpush3.bf16.msra.mxu1 %v1136_v61 }
  0x7b   :  { %1038 = vmatprep.subr.bf16.mxu1 %v1273_v58 }
  0x7c   :  { %999 = vmatpush3.bf16.msra.mxu0 %v1124_v47 }
  0x7d   :  { %1000 = vmatprep.subr.bf16.mxu0 %v1125_v49 }
  0x7e   :  { %1039 = vmatpush3.bf16.msra.mxu1 %v1137_v62 }
  0x7f   :  { %1040 = vmatprep.subr.bf16.mxu1 %v1273_v58 }
  0x80   :  { %1001 = vmatpush3.bf16.msra.mxu0 %v1126_v51 }
  0x81   :  { %1002 = vmatprep.subr.bf16.mxu0 %v1127_v52 }
  0x82   :  { %1041 = vmatpush3.bf16.msra.mxu1 %v1138_v63 }
  0x83   :  { %1042 = vmatprep.subr.bf16.mxu1 %v1273_v58 }
  0x84   :  { %1003 = vmatpush3.bf16.msra.mxu0 %v1128_v53 }
  0x85   :  { %1004 = vmatprep.subr.bf16.mxu0 %v1129_v54 }
  0x86   :  { %1043 = vmatpush3.bf16.msra.mxu1 %v1139_v0 }
  0x87   :  { %1044 = vmatprep.subr.bf16.mxu1 %v1273_v58 }
  0x88   :  { %1005 = vmatpush3.bf16.msra.mxu0 %v1130_v55 }
  0x89   :  { %1050 = vmatprep.subr.bf16.mxu0 %v1273_v58 }
  0x8a   :  { %1045 = vmatpush3.bf16.msra.mxu1 %v1140_v1 }
  0x8b   :  { %608 = vmatmul.mubr.bf16.vlgmr.msra.gmra.mrb[4].mxu0 %v877_v56 }
  0x8c   :  { %1066 = vmatprep.mubr.msk.bf16.mxu0 %vm1274_vm0, %v1273_v58  ;;  %1051 = vmatpush3.bf16.msra.mxu0 %v1141_v2 }
  0x8d   :  { %1052 = vmatprep.subr.bf16.mxu0 %v1273_v58 }
  0x90   :  { %1053 = vmatpush3.bf16.msra.mxu0 %v1142_v3 }
  0x91   :  { %1054 = vmatprep.subr.bf16.mxu0 %v1273_v58 }
  0x94   :  { %1055 = vmatpush3.bf16.msra.mxu0 %v1143_v4 }
  0x95   :  { %1056 = vmatprep.subr.bf16.mxu0 %v1273_v58 }
  0x98   :  { %1057 = vmatpush3.bf16.msra.mxu0 %v1144_v5 }
  0x99   :  { %1058 = vmatprep.subr.bf16.mxu0 %v1273_v58 }
  0x9c   :  { %1059 = vmatpush3.bf16.msra.mxu0 %v1145_v6 }
  0x9d   :  { %1060 = vmatprep.subr.bf16.mxu0 %v1273_v58 }
  0xa0   :  { %1061 = vmatpush3.bf16.msra.mxu0 %v1146_v7 }
  0xa1   :  { %1062 = vmatprep.subr.bf16.mxu0 %v1273_v58 }
  0xa4   :  { %1063 = vmatpush3.bf16.msra.mxu0 %v1147_v29 }
  0xa5   :  { %1064 = vmatprep.subr.bf16.mxu0 %v1273_v58 }
  0xa8   :  { %1065 = vmatpush3.bf16.msra.mxu0 %v1148_v30 }
 0x13e   :  { %v962_v8 = vpop.f32.mrb[0].mxu0 }
 0x13f   :  { %v984_v9 = vpop.f32.mrb[0].mxu1  ;;  %v963_v10 = vpop.f32.mrb[1].mxu0 }
 0x140   :  { %v985_v11 = vpop.f32.mrb[1].mxu1  ;;  %v964_v12 = vadd.f32 %v963_v10, %v962_v8  ;;  %v965_v14 = vpop.f32.mrb[2].mxu0 }
 0x141   :  { %v986_v13 = vadd.f32 %v985_v11, %v984_v9  ;;  %v987_v15 = vpop.f32.mrb[2].mxu1  ;;  %v966_v16 = vpop.f32.mrb[3].mxu0 }
 0x142   :  { %v988_v17 = vpop.f32.mrb[3].mxu1 }
 0x143   :  { %v570_v18 = vadd.f32 %v986_v13, %v964_v12 }
 0x15e   :  { %v1006_v19 = vpop.f32.mrb[4].mxu0 }
 0x15f   :  { %v1007_v20 = vpop.f32.mrb[5].mxu0 }
 0x160   :  { %v1008_v21 = vadd.f32 %v1007_v20, %v1006_v19  ;;  %v1009_v22 = vpop.f32.mrb[6].mxu0 }
 0x161   :  { %v1010_v24 = vpop.f32.mrb[7].mxu0 }
 0x162   :  { %v610_v25 = vadd.f32 %v1008_v21, %v570_v18 }
 0x164   :  { %v628_v26 = vadd.f32 %v927_v23, %v610_v25 }
 0x166   :  { %v629_v27 = vmax.f32 %v628_v26, 0.0 }
 0x168   :  { %v630_v28 = vpack.c.bf16 %v629_v27, %v629_v27 }
 0x16a   :  { %1047 = vmatmul.mubr.bf16.vlgmr.msra.gmra.mrb[4].mxu1 %v630_v28 }
 0x23d   :  { %v736_v32 = vpop.f32.mrb[4].mxu1 }
 0x23e   :  { %v737_v33 = vadd.f32 %v928_v31, %v736_v32  ;;  %v1048_v34 = vpop.f32.mrb[5].mxu1 }
 0x23f   :  { %v739_v35 = vpop.f32.mrb[6].mxu1 }
 0x240   :  { %v742_v36 = vmax.f32 %v737_v33, 0.0  ;;  %v1049_v37 = vpop.f32.mrb[7].mxu1 }
 0x242   :  { %v743_v38 = vpack.c.bf16 %v742_v36, %v742_v36 }
 0x244   :  { %1067 = vmatmul.mubr.bf16.vlgmr.msra.gmra.mrb[8].mxu0 %v743_v38 }
 0x317   :  { %v849_v40 = vpop.f32.mrb[8].mxu0 }
 0x318   :  { %v850_v41 = vadd.f32 %v937_v39, %v849_v40  ;;  %v1068_v42 = vpop.f32.mrb[9].mxu0 }
 0x319   :  { %v852_v43 = vpop.f32.mrb[10].mxu0 }
 0x31a   :  { %855 = vst [vmem:[#allocation11] sm:$0xff] %v850_v41  ;;  %v1069_v44 = vpop.f32.mrb[11].mxu0 }
 0x31b   :  { %1248 = shalt.err (!%p1245_p8)
}
 0x31c   :  { %s1249_s6 = scalar_lea.hbm %s1419_s7, 128 }
 0x31d   :  { %p1250_p9 = scmp.ne.s32.totalorder %s1419_s7, %s1249_s6  ;;  %p1253_p10 = scmp.lt.u32.totalorder %s1249_s6, %s1419_s7 }
 0x31f   :  { %p1255_p11 = pnand %p1253_p10, %p1250_p9 }
 0x321   :  { %1258 = shalt.err (!%p1255_p11)
}
 0x322   :  { %865 = dma.vmem_to_hbm [thread:$0]  %s863_s29, 128, %s1419_s7, [#allocation5]  }
 0x323   :  { %1265 = dma.done.wait [#allocation5], 128  }
 0x324   :  { %1266 = vsyncadd [#allocation5], 4294967168 }
 0x325   :  { %869 = vsyncpa [#allocation4], 1 }
 0x326   :  { %870 = vsyncpa [#allocation7], 1 }
 0x327   :  { %871 = vsyncpa [#allocation10], 1 }
 0x328   :  { %872 = vsyncpa [#allocation5], 1 }

</bundles_post_ra>
